<compile_context>
chip_gen: v6e
topology: v6e:2x2x1
jax: 0.10.0
libtpu: 0.0.40
codegen_flags: <defaults>
</compile_context>

<pallas_src>
import functools
import math

import jax
import jax.numpy as jnp
from jax import lax
from jax.experimental import pallas as pl
from jax.experimental.pallas import tpu as pltpu


# ----------------------------- Pallas kernel --------------------------------
def _fused_deconv_kernel(x_ref, w_ref, b_ref, o_ref, *, offsets, lane_tile,
                         row_steps):
    """One batch element x one row tile: all phases / all taps in one matmul.

    x_ref: (1, Cin_p, Hpad*Wpad)   flattened zero-padded input (channels-first)
    w_ref: (M, Kc)                 fused block weight, M = s^2*Cout, Kc = Cin_p*Dh*Dw
    b_ref: (M, 1)                  f32 bias, broadcast along lanes in-kernel
    o_ref: (1, M, lane_tile)       per-phase outputs, lane-dense
    offsets: static flat input offsets, one per distinct (row, col) shift.
    """
    if row_steps == 1:
        base = 0                                   # fully static slices
    else:
        base = pl.program_id(1) * lane_tile
        if lane_tile % 128 == 0:
            base = pl.multiple_of(base, 128)

    # Channel-stacked shifted views of the input ("pre-shift once per distinct
    # offset").  Cin_p is a multiple of the f32 sublane tile, so the concat is
    # tile-aligned.
    pieces = [x_ref[0, :, pl.ds(base + off, lane_tile)] for off in offsets]
    xcat = pieces[0] if len(pieces) == 1 else jnp.concatenate(pieces, axis=0)

    acc = jnp.dot(w_ref[...], xcat, preferred_element_type=jnp.float32)
    acc = acc + b_ref[...]                          # (M, 1) -> lane broadcast
    o_ref[0, :, :] = acc.astype(o_ref.dtype)


# ----------------------------- wrapper helpers -------------------------------
def _to_conv_hwio(w_t):
    """ConvTranspose2d weight (Cin_h, Cout_h, K, K) -> equivalent regular-conv
    HWIO weight (spatially flipped, in/out channels swapped)."""
    return jnp.flip(w_t, axis=(2, 3)).transpose(2, 3, 0, 1)


def _shift_set(K, stride, lo):
    """Union (over output phases) of polyphase input shifts along one dim."""
    shifts = set()
    for ph in range(stride):
        for kk in range(K):
            if (kk + ph - lo) % stride == 0:
                shifts.add((kk + ph - lo) // stride)
    return sorted(shifts)


def _align_lane_extent(Hop, Wpad, max_ratio=1.5):
    """Minimally pad (Hop, Wpad) so Hop*Wpad % 128 == 0 (unmasked, lane-dense
    stores).  Falls back to no padding if that would inflate the output slab
    by more than `max_ratio`."""
    base = Hop * Wpad
    best = None
    for hp in range(Hop, Hop + 128):
        step = 128 // math.gcd(128, hp)
        wp = -(-Wpad // step) * step
        if best is None or hp * wp < best[0] * best[1]:
            best = (hp, wp)
    if best[0] * best[1] > max_ratio * base:
        return Hop, Wpad
    return best


def _vmem_estimate(Cin_p, Hpad, Wpad, M, Kc, lane_tile, itemsize):
    x_blk = Cin_p * Hpad * Wpad * itemsize
    w_blk = M * Kc * itemsize
    b_blk = M * 4
    out_blk = M * lane_tile * itemsize
    xcat = Kc * lane_tile * 4
    acc = M * lane_tile * 4
    # double-buffered blocks + in-kernel f32 intermediates
    return 2 * (x_blk + w_blk + b_blk + out_blk) + xcat + acc


def _choose_row_tile(Hop, Wpad, est_fn, budget):
    """Largest divisor of Hop whose tile keeps the VMEM estimate under budget.
    Tiles smaller than Hop must keep the lane extent a multiple of 128
    (BlockSpec (8,128) rule / unmasked stores)."""
    legal = [t for t in range(1, Hop + 1)
             if Hop % t == 0 and (t == Hop or (t * Wpad) % 128 == 0)]
    for t in sorted(legal, reverse=True):
        if est_fn(t * Wpad) <= budget:
            return t
    return legal[0]        # smallest legal tile (may still exceed the budget)


# ----------------------------- public forward --------------------------------
def complex_deconv2d(x_nchw, w_r, w_i, b_r, b_i, *, stride, pad, output_pad,
                     compute_dtype=None, vmem_budget_bytes=20 * 2**20):
    """Matches ComplexDeconv2D.forward.  x_nchw: (B,Cin,H,W) -> (B,Cout,Ho,Wo)."""
    B, Cin, H, W = x_nchw.shape
    cin_h, cout_h, K, K2 = w_r.shape
    assert K == K2
    assert Cin == 2 * cin_h and cin_h >= 1 and cout_h >= 1, \
        "standard split case (in_channel >= 2, out_channel >= 2) only"
    # TODO(synk): the in_channel==1 / out_channel==1 special branches of the
    # PyTorch module are not implemented here.
    Cout = 2 * cout_h
    s = int(stride)
    dtype = jnp.dtype(compute_dtype) if compute_dtype is not None else x_nchw.dtype
    out_dtype = x_nchw.dtype
    itemsize = jnp.dtype(dtype).itemsize

    # Fold the complex structure into one real conv (HWIO block weight / bias).
    wc_r = _to_conv_hwio(w_r)
    wc_i = _to_conv_hwio(w_i)
    w_block = jnp.concatenate(
        [jnp.concatenate([wc_r, wc_i], axis=3),
         jnp.concatenate([-wc_i, wc_r], axis=3)],
        axis=2)                                                # (K,K,Cin,Cout)
    b_block = jnp.concatenate([b_r - b_i, b_r + b_i], axis=0)  # (Cout,)

    lo = K - 1 - pad
    assert lo >= 0, "pad > ksize-1 unsupported"  # TODO(synk): needs output cropping
    Hout = (H - 1) * s - 2 * pad + K + output_pad
    Wout = (W - 1) * s - 2 * pad + K + output_pad
    assert Hout > 0 and Wout > 0 and output_pad >= 0

    Hop = -(-Hout // s)            # per-phase output rows
    Wop = -(-Wout // s)            # per-phase output cols

    # Union of distinct polyphase input shifts along each spatial dim.
    SH = _shift_set(K, s, lo)
    SW = _shift_set(K, s, lo)
    Dh, Dw = len(SH), len(SW)

    # Zero-padding of the ORIGINAL input: every shifted read of a *valid*
    # output position either hits real data or explicit zeros.
    PT = max(0, -SH[0])
    PL = max(0, -SW[0])
    PR_need = max(0, (Wop - 1 + SW[-1]) - (W - 1))
    Wpad = max(PL + W + PR_need, Wop)

    # Pad the flattened per-phase lane extent to a multiple of 128.
    Hop_p, Wpad = _align_lane_extent(Hop, Wpad)
    n_lane = Hop_p * Wpad
    PR = Wpad - PL - W

    # Per-shift flat offsets; bottom padding so every flat read is in-bounds
    # (out-of-image reads land in explicit zero padding -> correct).
    offsets = [(u + PT) * Wpad + (v + PL) for u in SH for v in SW]
    Hpad = max(PT + H, -(-(max(offsets) + n_lane) // Wpad))
    PB = Hpad - PT - H

    # Pad input channels to the sublane tile so the channel-stacking concat in
    # the kernel is tile-aligned (f32 -> 8, bf16 -> 16, ...).
    sub = 8 * (4 // max(1, itemsize))
    Cin_p = -(-Cin // sub) * sub

    M = s * s * Cout               # fused output rows: (phase, out-channel)
    Kc = Cin_p * Dh * Dw           # fused contraction: (shift, in-channel)

    # Fused block weight: zero where a phase has no tap at a given shift.
    w_oc = jnp.transpose(w_block, (0, 1, 3, 2))          # (K, K, Cout, Cin)
    w6 = jnp.zeros((s, s, Cout, Dh, Dw, Cin_p), jnp.float32)
    for p_h in range(s):
        for p_w in range(s):
            for iu, u in enumerate(SH):
                kh = lo - p_h + u * s
                if not (0 <= kh < K):
                    continue
                for iv, v in enumerate(SW):
                    kw = lo - p_w + v * s
                    if not (0 <= kw < K):
                        continue
                    w6 = w6.at[p_h, p_w, :, iu, iv, :Cin].set(
                        w_oc[kh, kw].astype(jnp.float32))
    w_fused = w6.reshape(M, Kc).astype(dtype)
    # TODO(synk): for large Cin/Cout a per-phase grouping with exact taps
    # (K-dim = Cin * taps) avoids the zero-filled shift combinations.

    b_fused = jnp.tile(b_block.astype(jnp.float32), s * s).reshape(M, 1)

    # NCHW already has channels on sublanes / spatial minor: pad + flatten.
    x_pad = jnp.pad(x_nchw.astype(dtype),
                    ((0, 0), (0, Cin_p - Cin), (PT, PB), (PL, PR)))
    x_flat = x_pad.reshape(B, Cin_p, Hpad * Wpad)

    # Row-tile the per-phase output so the f32 accumulator / output block stay
    # inside the VMEM budget at production image sizes.
    def est_fn(lane_tile):
        return _vmem_estimate(Cin_p, Hpad, Wpad, M, Kc, lane_tile, itemsize)

    TR = _choose_row_tile(Hop_p, Wpad, est_fn, vmem_budget_bytes)
    R = Hop_p // TR
    lane_tile = TR * Wpad
    vmem_limit = int(min(max(2 * est_fn(lane_tile), 32 * 2**20), 64 * 2**20))

    kernel = functools.partial(_fused_deconv_kernel, offsets=offsets,
                               lane_tile=lane_tile, row_steps=R)
    y_flat = pl.pallas_call(
        kernel,
        out_shape=jax.ShapeDtypeStruct((B, M, n_lane), out_dtype),
        grid_spec=pltpu.PrefetchScalarGridSpec(
            num_scalar_prefetch=0,
            grid=(B, R),
            in_specs=[
                # Full per-batch input stays resident across the row-tile axis
                # (block index depends only on b -> not re-fetched per r).
                pl.BlockSpec((1, Cin_p, Hpad * Wpad), lambda b, r: (b, 0, 0)),
                pl.BlockSpec((M, Kc), lambda b, r: (0, 0)),
                pl.BlockSpec((M, 1), lambda b, r: (0, 0)),
            ],
            out_specs=pl.BlockSpec((1, M, lane_tile), lambda b, r: (b, 0, r)),
        ),
        compiler_params=pltpu.CompilerParams(
            dimension_semantics=("parallel", "parallel"),
            vmem_limit_bytes=vmem_limit),
    )(x_flat, w_fused, b_fused)

    # Pixel-shuffle the phases back into (B, Cout, Hout, Wout); crop garbage.
    y = y_flat.reshape(B, s, s, Cout, Hop_p, Wpad)[..., :Wop]
    y = jnp.transpose(y, (0, 3, 4, 1, 5, 2)).reshape(B, Cout, Hop_p * s, Wop * s)
    return y[:, :, :Hout, :Wout]


# ----------------------------- pure-JAX reference ----------------------------
def _deconv_ref_nchw(x_half_nchw, w_t, b, stride, pad, opad):
    x_nhwc = jnp.transpose(x_half_nchw, (0, 2, 3, 1))
    K = w_t.shape[-1]
    w_conv = _to_conv_hwio(w_t)
    lo = K - 1 - pad
    hi = K - 1 - pad + opad
    y = lax.conv_general_dilated(
        x_nhwc, w_conv, window_strides=(1, 1),
        padding=[(lo, hi), (lo, hi)], lhs_dilation=(stride, stride),
        dimension_numbers=("NHWC", "HWIO", "NHWC"))
    y = y + b
    return jnp.transpose(y, (0, 3, 1, 2))


def _check(key, B, IN_CH, OUT_CH, H, W, K, stride, pad, opad):
    cin_h, cout_h = IN_CH // 2, OUT_CH // 2
    k1, k2, k3, k4, k5 = jax.random.split(key, 5)
    x = jax.random.normal(k1, (B, IN_CH, H, W), jnp.float32)
    # ConvTranspose2d weight shape: (in_channels_half, out_channels_half, K, K)
    w_r = 0.1 * jax.random.normal(k2, (cin_h, cout_h, K, K), jnp.float32)
    w_i = 0.1 * jax.random.normal(k3, (cin_h, cout_h, K, K), jnp.float32)
    b_r = 0.1 * jax.random.normal(k4, (cout_h,), jnp.float32)
    b_i = 0.1 * jax.random.normal(k5, (cout_h,), jnp.float32)

    out = complex_deconv2d(x, w_r, w_i, b_r, b_i,
                           stride=stride, pad=pad, output_pad=opad)
    out = jax.block_until_ready(out)

    # Reference mirroring the PyTorch forward (four deconvs + combine).
    x_r, x_i = x[:, :cin_h], x[:, cin_h:]
    mr_kr = _deconv_ref_nchw(x_r, w_r, b_r, stride, pad, opad)
    mi_ki = _deconv_ref_nchw(x_i, w_i, b_i, stride, pad, opad)
    mi_kr = _deconv_ref_nchw(x_i, w_r, b_r, stride, pad, opad)
    mr_ki = _deconv_ref_nchw(x_r, w_i, b_i, stride, pad, opad)
    ref = jnp.concatenate([mr_kr - mi_ki, mr_ki + mi_kr], axis=1)

    Ho = (H - 1) * stride - 2 * pad + K + opad
    assert out.shape == (B, OUT_CH, Ho, Ho), out.shape
    err = float(jnp.max(jnp.abs(out - ref)))
    assert err < 1e-4, f"max abs err {err}"


if __name__ == "__main__":
    key = jax.random.PRNGKey(0)
    k_a, k_b, k_c = jax.random.split(key, 3)
    # Common guided-diffusion use: 2x upsampling transposed conv.
    _check(k_a, B=2, IN_CH=4, OUT_CH=8, H=16, W=16, K=4, stride=2, pad=1, opad=0)
    # Degenerate polyphase path (stride 1, single phase).
    _check(k_b, B=2, IN_CH=4, OUT_CH=8, H=16, W=16, K=3, stride=1, pad=1, opad=0)
    # Odd sizes + output_padding (exercises the unaligned-lane fallback).
    _check(k_c, B=2, IN_CH=6, OUT_CH=6, H=10, W=10, K=3, stride=2, pad=1, opad=1)
    print("KERNEL_OK")
</pallas_src>

<mosaic_0001>
module attributes {stable_mosaic.version = 11 : i64} {
  func.func @_fused_deconv_kernel(%arg0: i32, %arg1: i32, %arg2: memref<1x8x456xf32, #tpu.memory_space<vmem>>, %arg3: memref<32x72xf32, #tpu.memory_space<vmem>>, %arg4: memref<32x1xf32, #tpu.memory_space<vmem>>, %arg5: memref<1x32x384xf32, #tpu.memory_space<vmem>>) attributes {dimension_semantics = [#tpu.dimension_semantics<parallel>, #tpu.dimension_semantics<parallel>], iteration_bounds = array<i64: 2, 1>, scalar_prefetch = 0 : i64, scratch_operands = 0 : i64, tpu.core_type = #tpu.core_type<tc>, window_params = [{transform_indices = @transform_0, window_bounds = array<i64: 1, 8, 456>}, {pipeline_mode = #tpu.pipeline_mode<synchronous>, transform_indices = @transform_1, window_bounds = array<i64: 32, 72>}, {pipeline_mode = #tpu.pipeline_mode<synchronous>, transform_indices = @transform_2, window_bounds = array<i64: 32, 1>}, {transform_indices = @transform_3, window_bounds = array<i64: 1, 32, 384>}]} {
    %c0 = arith.constant 0 : index
    %c0_0 = arith.constant 0 : index
    %c0_1 = arith.constant 0 : index
    %0 = vector.load %arg2[%c0, %c0_0, %c0_1] : memref<1x8x456xf32, #tpu.memory_space<vmem>>, vector<1x8x384xf32>
    %1 = vector.shape_cast %0 : vector<1x8x384xf32> to vector<8x384xf32>
    %c0_2 = arith.constant 0 : index
    %c0_3 = arith.constant 0 : index
    %c1 = arith.constant 1 : index
    %2 = vector.load %arg2[%c0_2, %c0_3, %c1] : memref<1x8x456xf32, #tpu.memory_space<vmem>>, vector<1x8x384xf32>
    %3 = vector.shape_cast %2 : vector<1x8x384xf32> to vector<8x384xf32>
    %c0_4 = arith.constant 0 : index
    %c0_5 = arith.constant 0 : index
    %c2 = arith.constant 2 : index
    %4 = vector.load %arg2[%c0_4, %c0_5, %c2] : memref<1x8x456xf32, #tpu.memory_space<vmem>>, vector<1x8x384xf32>
    %5 = vector.shape_cast %4 : vector<1x8x384xf32> to vector<8x384xf32>
    %c0_6 = arith.constant 0 : index
    %c0_7 = arith.constant 0 : index
    %c24 = arith.constant 24 : index
    %6 = vector.load %arg2[%c0_6, %c0_7, %c24] : memref<1x8x456xf32, #tpu.memory_space<vmem>>, vector<1x8x384xf32>
    %7 = vector.shape_cast %6 : vector<1x8x384xf32> to vector<8x384xf32>
    %c0_8 = arith.constant 0 : index
    %c0_9 = arith.constant 0 : index
    %c25 = arith.constant 25 : index
    %8 = vector.load %arg2[%c0_8, %c0_9, %c25] : memref<1x8x456xf32, #tpu.memory_space<vmem>>, vector<1x8x384xf32>
    %9 = vector.shape_cast %8 : vector<1x8x384xf32> to vector<8x384xf32>
    %c0_10 = arith.constant 0 : index
    %c0_11 = arith.constant 0 : index
    %c26 = arith.constant 26 : index
    %10 = vector.load %arg2[%c0_10, %c0_11, %c26] : memref<1x8x456xf32, #tpu.memory_space<vmem>>, vector<1x8x384xf32>
    %11 = vector.shape_cast %10 : vector<1x8x384xf32> to vector<8x384xf32>
    %c0_12 = arith.constant 0 : index
    %c0_13 = arith.constant 0 : index
    %c48 = arith.constant 48 : index
    %12 = vector.load %arg2[%c0_12, %c0_13, %c48] : memref<1x8x456xf32, #tpu.memory_space<vmem>>, vector<1x8x384xf32>
    %13 = vector.shape_cast %12 : vector<1x8x384xf32> to vector<8x384xf32>
    %c0_14 = arith.constant 0 : index
    %c0_15 = arith.constant 0 : index
    %c49 = arith.constant 49 : index
    %14 = vector.load %arg2[%c0_14, %c0_15, %c49] : memref<1x8x456xf32, #tpu.memory_space<vmem>>, vector<1x8x384xf32>
    %15 = vector.shape_cast %14 : vector<1x8x384xf32> to vector<8x384xf32>
    %c0_16 = arith.constant 0 : index
    %c0_17 = arith.constant 0 : index
    %c50 = arith.constant 50 : index
    %16 = vector.load %arg2[%c0_16, %c0_17, %c50] : memref<1x8x456xf32, #tpu.memory_space<vmem>>, vector<1x8x384xf32>
    %17 = vector.shape_cast %16 : vector<1x8x384xf32> to vector<8x384xf32>
    %18 = tpu.concatenate %1, %3, %5, %7, %9, %11, %13, %15, %17 in 0 : vector<8x384xf32>, vector<8x384xf32>, vector<8x384xf32>, vector<8x384xf32>, vector<8x384xf32>, vector<8x384xf32>, vector<8x384xf32>, vector<8x384xf32>, vector<8x384xf32> -> vector<72x384xf32>
    %c0_18 = arith.constant 0 : index
    %c0_19 = arith.constant 0 : index
    %19 = vector.load %arg3[%c0_18, %c0_19] : memref<32x72xf32, #tpu.memory_space<vmem>>, vector<32x72xf32>
    %cst = arith.constant dense<0.000000e+00> : vector<32x384xf32>
    %20 = tpu.matmul %19, %18, %cst {dimension_numbers = #tpu.dot_dimension_numbers<[1], [0], [0], [1], [0, 0, 1, 1], [], []>} : vector<32x72xf32>, vector<72x384xf32>, vector<32x384xf32> -> vector<32x384xf32>
    %c0_20 = arith.constant 0 : index
    %c0_21 = arith.constant 0 : index
    %21 = vector.load %arg4[%c0_20, %c0_21] : memref<32x1xf32, #tpu.memory_space<vmem>>, vector<32x1xf32>
    %22 = vector.broadcast %21 : vector<32x1xf32> to vector<32x384xf32>
    %23 = arith.addf %20, %22 : vector<32x384xf32>
    %c0_22 = arith.constant 0 : index
    %c0_23 = arith.constant 0 : index
    %c0_24 = arith.constant 0 : index
    %24 = vector.load %arg5[%c0_22, %c0_23, %c0_24] : memref<1x32x384xf32, #tpu.memory_space<vmem>>, vector<1x32x384xf32>
    %25 = vector.shape_cast %24 : vector<1x32x384xf32> to vector<32x384xf32>
    %26 = vector.shape_cast %23 : vector<32x384xf32> to vector<1x32x384xf32>
    tpu.vector_store %arg5[%c0_22, %c0_23, %c0_24], %26 {strides = array<i32>} : memref<1x32x384xf32, #tpu.memory_space<vmem>>, vector<1x32x384xf32>,
    return
  }
  func.func @transform_0(%arg0: i32, %arg1: i32) -> (i32, i32, i32) {
    %c0_i32 = arith.constant 0 : i32
    %c0_i32_0 = arith.constant 0 : i32
    %c0_i32_1 = arith.constant 0 : i32
    return %arg0, %c0_i32, %c0_i32_0 : i32, i32, i32
  }
  func.func @transform_1(%arg0: i32, %arg1: i32) -> (i32, i32) {
    %c0_i32 = arith.constant 0 : i32
    %c0_i32_0 = arith.constant 0 : i32
    %c0_i32_1 = arith.constant 0 : i32
    return %c0_i32, %c0_i32_0 : i32, i32
  }
  func.func @transform_2(%arg0: i32, %arg1: i32) -> (i32, i32) {
    %c0_i32 = arith.constant 0 : i32
    %c0_i32_0 = arith.constant 0 : i32
    %c0_i32_1 = arith.constant 0 : i32
    return %c0_i32, %c0_i32_0 : i32, i32
  }
  func.func @transform_3(%arg0: i32, %arg1: i32) -> (i32, i32, i32) {
    %c0_i32 = arith.constant 0 : i32
    %c0_i32_0 = arith.constant 0 : i32
    return %arg0, %c0_i32, %arg1 : i32, i32, i32
  }
}

</mosaic_0001>

<bundles_post_ra>
// kernel: tpu_custom_call.1
= control target key start
LH: loop header
LB: loop body
LE: loop exit
PB: predicated region body
PF: predicated region fallthrough
CT: control target
= control target key end

     0   :  { %8 = vsyncpa [#allocation3], 0  ;;  %s1199_s0 = inlined_call_operand.hbm [shape: f32[2,8,456], index: 0, kind: input, shape index: {}]   ;;  %s1200_s1 = inlined_call_operand.vmem [shape: f32[32,72], index: 1, kind: input, shape index: {}]   ;;  %s1201_s2 = inlined_call_operand.vmem [shape: f32[32,1], index: 2, kind: input, shape index: {}]   ;;  %s1202_s3 = inlined_call_operand.hbm [shape: f32[2,32,384], index: 3, kind: output, shape index: {}]  }
   0x1   :  { %10 = vsyncpa [#allocation3 + $0x1], 0 }
   0x2   :  { %11 = vsyncpa [#allocation4], 0 }
   0x3   :  { %13 = vsyncpa [#allocation4 + $0x1], 0  ;;  %s937_s12 = smov 0   ;;  %s939_s13 = smov 0  }
   0x4   :  { %s941_s14 = smov 0   ;;  %s943_s15 = smov 0  }
   0x5   :  { %s945_s16 = smov 0   ;;  %s947_s17 = smov 0  }
   0x6 LB: > { %s657_s18 = sadd.s32 4294967295, %s901_s17   ;;  %s658_s19 = sadd.s32 4294967294, %s901_s17   ;;  %s901_s17 = sphi %s947_s17, %s19_s17   ;;  %s897_s16 = sphi %s945_s16, %s1214_s16   ;;  %s893_s15 = sphi %s943_s15, %s1213_s15   ;;  %s889_s14 = sphi %s941_s14, %s1212_s14   ;;  %s885_s13 = sphi %s939_s13, %s1211_s13   ;;  %s881_s12 = sphi %s937_s12, %s1210_s12  }
   0x7   : > { %s31_s20 = sadd.s32 1, %s897_s16  ;;  %s38_s21 = sadd.s32 1, %s889_s14 }
   0x8   : > { %p33_p0 = scmp.ge.s32.totalorder %s31_s20, 2  ;;  %p45_p1 = scmp.ne.s32.totalorder %s889_s14, %s885_s13 }
   0x9   : > { %p46_p2 = scmp.eq.s32.totalorder %s901_s17, 0  ;;  %p51_p3 = scmp.ne.s32.totalorder %s885_s13, %s881_s12 }
   0xa   : > { %s1216_s20 = smov (%p33_p0, %s31_s20), 0  ;;  %p52_p5 = scmp.eq.s32.totalorder %s657_s18, 0 }
   0xb   : > { %p978_p4 = por %p46_p2, %p45_p1  ;;  %s35_s23 = ssub.s32 %s897_s16, %s1216_s20 }
   0xc   : > { %p119_p6 = scmp.eq.s32.totalorder %s657_s18, 1  ;;  %p36_p7 = scmp.eq.s32.totalorder %s35_s23, 0 }
   0xd   : > { %p984_p8 = por %p52_p5, %p51_p3  ;;  %p125_p10 = scmp.eq.s32.totalorder %s658_s19, 1 }
   0xe   : > { %p988_p9 = por %p119_p6, %p45_p1  ;;  %p729_p13 = scmp.lt.s32.totalorder %s901_s17, 2 }
   0xf   : > { %s993_s26 = scalar_select %p36_p7, %s889_s14, %s38_s21  }
  0x10   : > { %p995_p11 = por %p125_p10, %p51_p3  ;;  %s151_s28 = sand.u32 1, %s889_s14  }
  0x11   : > { %s661_s29 = sshll.u32 %s151_s28, 5  ;;  %s677_s30 = sshll.u32 %s897_s16, 9 }
  0x12   : > { %s1206_s27 = scalar_select %p995_p11, 1, 0 }
  0x13   : > { %s161_s6 = scalar_lea.hbm %s1199_s0, %s677_s30  ;;  %s155_s7 = scalar_lea.vmem [#allocation2], %s661_s29 }
  0x14   : > { %s163_s8 = sshll.u32 %s155_s7, 4  ;;  %p1008_p0 = pnand %p729_p13, %p978_p4  ;;  %s164_s8 = int_to_ptr.vmem [resolvable:$true] %s163_s8 }
  0x15   : > { %p664_p1 = scmp.ge.s32.totalorder %s901_s17, 1  ;;  %p168_p2 = scmp.lt.s32.totalorder %s901_s17, 3 }
  0x16   : > { %s152_s10 = scalar_lea.sflag [#allocation3], %s151_s28  ;;  %p795_p3 = pneg %p1008_p0 }
  0x17   : > { %s806_s11 = scalar_lea.vmem %s164_s8, 512  ;;  %s903_s18 = smov [#allocation2]  }
  0x18   : > { %p807_p5 = scmp.ne.s32.totalorder %s164_s8, %s806_s11  ;;  %s811_s19 = sshll.u32 %s903_s18, 4  ;;  %s812_s19 = int_to_ptr.vmem [resolvable:$false] %s811_s19 }
  0x19   : > { %s813_s21 = scalar_lea.vmem %s812_s19, 1024  ;;  %p814_p10 = scmp.lt.s32.totalorder %s164_s8, %s812_s19 }
  0x1a   : > { %p809_p6 = pnand %p807_p5, %p795_p3  ;;  %p815_p12 = scmp.lt.s32.totalorder %s813_s21, %s806_s11 }
  0x1c   : > { %p810_p7 = pneg %p809_p6  ;;  %p816_p4 = por %p815_p12, %p814_p10 }
  0x1e   : > { %p817_p13 = pnand %p816_p4, %p810_p7 }
  0x20   : > { %820 = shalt.err (!%p817_p13)
}
  0x21   : > { %724 = dma.hbm_to_vmem [thread:$0]  (!%p1008_p0), %s161_s6, 512, %s164_s8, %s152_s10  }
  0x22   : > { %p169_p11 = pnand %p664_p1, %p168_p2 }
  0x23   : > { %s1023_s22 = sand.u32 (!%p169_p11), 1, %s885_s13  }
  0x24   : > { %172 = sbr.rel (%p169_p11) target bundleno = 440 (0x1b8), region = 32  ;;  %s665_s23 = sshll.u32 (!%p169_p11), %s1023_s22, 5 }
  0x25   : > { %s175_s28 = scalar_lea.sflag (!%p169_p11), [#allocation3], %s1023_s22  ;;  %s178_s29 = scalar_lea.vmem (!%p169_p11), [#allocation2], %s665_s23 }
  0x29   : > { %872 = dma.done.wait (%p984_p8), %s175_s28, 512  }
  0x2a   : > { %874 = vsyncadd (%p984_p8), %s175_s28, 4294966784  ;;  %v1031_v0 = vld [vmem:[%s178_s29 + $0x8] sm:$0xff]  ;;  %v1033_v1 = vld [vmem:[%s178_s29] sm:$0xff]  ;;  %s904_s30 = smov 78   ;;  %s905_s4 = smov 79   ;;  %v911_v4 = vmov 0.0  }
  0x2b   : > { %317 = vrot.lane.b32.xlu0 %v1031_v0, %s904_s30  ;;  %315 = vrot.lane.b32.xlu1 %v1033_v1, %s904_s30  ;;  %v1037_v2 = vld [vmem:[%s178_s29 + $0x10] sm:$0xff]  ;;  %s906_s24 = smov 80   ;;  %s907_s5 = smov 102   ;;  %v205_v3 = vld [vmem:[%s178_s29 + $0x18] sm:$0xff]  ;;  %vm358_vm0 = vcmask 588800   ;;  %v913_v6 = vmov 0  }
  0x2c   : > { %s908_s6 = smov 103   ;;  %s909_s7 = smov 104   ;;  %435 = vmatprep.mubr.f32.mxu0 %v911_v4  ;;  %v1061_v5 = vld [vmem:[%s1200_s1] sm:$0xff]  ;;  %791 = vset.pattern.permute.xlu0 %v913_v6  ;;  %v335_v8 = vld [vmem:[%s1201_s2 + $0x8] sm:$0xff]  ;;  %v336_v9 = vld [vmem:[%s1201_s2 + $0x10] sm:$0xff]  ;;  %vm323_vm1 = vcmask 637952  }
  0x2d   : > { %s910_s8 = smov 126   ;;  %709 = vmatprep.mubr.msk.f32.mxu1 %vm358_vm0, %v1061_v5  ;;  %s912_s11 = smov 127   ;;  %792 = vset.pattern.permute.xlu1 %v913_v6  ;;  %v334_v7 = vld [vmem:[%s1201_s2] sm:$0xff]  ;;  %v337_v10 = vld [vmem:[%s1201_s2 + $0x18] sm:$0xff]  ;;  %vm308_vm2 = vcmask 646144   ;;  %vm293_vm3 = vcmask 654336  }
  0x2e   : > { %vm278_vm4 = vcmask 834560   ;;  %vm263_vm5 = vcmask 842752   ;;  %vm248_vm6 = vcmask 850944   ;;  %vm233_vm7 = vcmask 1031168   ;;  %v331_v62 = vld [vmem:[%s1200_s1 + $0x8] sm:$0xff]  ;;  %s715_s10 = smul.u32 96, %s1023_s22 }
  0x2f   : > { %319 = vrot.lane.b32.xlu0 %v1037_v2, %s904_s30  ;;  %302 = vrot.lane.b32.xlu1 %v1031_v0, %s905_s4  ;;  %vm218_vm8 = vcmask 1039360   ;;  %s716_s18 = smul.u32 1536, %s893_s15  ;;  %s558_s15 = scalar_lea.sflag [#allocation4], %s1023_s22 }
  0x31   : > { %s1147_s28 = scalar_lea.hbm %s1202_s3, %s716_s18 }
  0x33   : > { %304 = vrot.lane.b32.xlu0 %v1037_v2, %s905_s4  ;;  %300 = vrot.lane.b32.xlu1 %v1033_v1, %s905_s4 }
  0x37   : > { %287 = vrot.lane.b32.xlu0 %v1031_v0, %s906_s24  ;;  %289 = vrot.lane.b32.xlu1 %v1037_v2, %s906_s24 }
  0x3b   : > { %285 = vrot.lane.b32.xlu0 %v1033_v1, %s906_s24  ;;  %272 = vrot.lane.b32.xlu1 %v1031_v0, %s907_s5 }
  0x3f   : > { %274 = vrot.lane.b32.xlu0 %v1037_v2, %s907_s5  ;;  %270 = vrot.lane.b32.xlu1 %v1033_v1, %s907_s5 }
  0x43   : > { %257 = vrot.lane.b32.xlu0 %v1031_v0, %s908_s6  ;;  %259 = vrot.lane.b32.xlu1 %v1037_v2, %s908_s6 }
  0x47   : > { %321 = vrot.lane.b32.xlu0 %v205_v3, %s904_s30  ;;  %255 = vrot.lane.b32.xlu1 %v1033_v1, %s908_s6  ;;  %s914_s30 = smov [#allocation5]  }
  0x4b   : > { %242 = vrot.lane.b32.xlu0 %v1031_v0, %s909_s7  ;;  %244 = vrot.lane.b32.xlu1 %v1037_v2, %s909_s7 }
  0x4f   : > { %306 = vrot.lane.b32.xlu0 %v205_v3, %s905_s4  ;;  %240 = vrot.lane.b32.xlu1 %v1033_v1, %s909_s7  ;;  %s825_s4 = sshll.u32 %s914_s30, 4  ;;  %s826_s4 = int_to_ptr.vmem [resolvable:$false] %s825_s4 }
  0x53   : > { %227 = vrot.lane.b32.xlu0 %v1031_v0, %s910_s8  ;;  %229 = vrot.lane.b32.xlu1 %v1037_v2, %s910_s8 }
  0x57   : > { %291 = vrot.lane.b32.xlu0 %v205_v3, %s906_s24  ;;  %225 = vrot.lane.b32.xlu1 %v1033_v1, %s910_s8  ;;  %s827_s24 = scalar_lea.vmem %s826_s4, 3072 }
  0x5b   : > { %212 = vrot.lane.b32.xlu0 %v1031_v0, %s912_s11  ;;  %214 = vrot.lane.b32.xlu1 %v1037_v2, %s912_s11 }
  0x5f   : > { %276 = vrot.lane.b32.xlu0 %v205_v3, %s907_s5  ;;  %210 = vrot.lane.b32.xlu1 %v1033_v1, %s912_s11 }
  0x63   : > { %261 = vrot.lane.b32.xlu0 %v205_v3, %s908_s6  ;;  %246 = vrot.lane.b32.xlu1 %v205_v3, %s909_s7 }
  0x67   : > { %231 = vrot.lane.b32.xlu0 %v205_v3, %s910_s8  ;;  %216 = vrot.lane.b32.xlu1 %v205_v3, %s912_s11  ;;  %s1130_s11 = scalar_lea.vmem [#allocation5], %s715_s10 }
  0x68   : > { %s573_s19 = sshll.u32 %s1130_s11, 4  ;;  %s1149_s19 = int_to_ptr.vmem [resolvable:$true] %s573_s19 }
  0x69   : > { %s821_s29 = scalar_lea.vmem %s1149_s19, 1536  ;;  %p828_p0 = scmp.lt.s32.totalorder %s1149_s19, %s826_s4 }
  0x6a   : > { %p822_p8 = scmp.ne.s32.totalorder %s1149_s19, %s821_s29  ;;  %p829_p1 = scmp.lt.s32.totalorder %s827_s24, %s821_s29 }
  0x6b   : > { %340 = vperm.xlu0 %791, %v334_v7   ;;  %345 = vperm.xlu1 %792, %v335_v8   ;;  %v333_v7 = vld [vmem:[%s1200_s1 + $0x18] sm:$0xff] }
  0x6c   : > { %p823_p11 = pnand %p822_p8, %p988_p9  ;;  %p830_p2 = por %p829_p1, %p828_p0 }
  0x6e   : > { %p824_p12 = pneg %p823_p11 }
  0x6f   : > { %350 = vperm.xlu1 %792, %v336_v9   ;;  %355 = vperm.xlu0 %791, %v337_v10  }
  0x70   : > { %p831_p3 = pnand %p830_p2, %p824_p12 }
  0x9d   : > { %v318_v11 = vpop.permute.xlu0 %317  ;;  %v316_v12 = vpop.permute.xlu1 %315 }
  0x9e   : > { %v324_v16 = vsel %vm323_vm1, %v316_v12, %v318_v11 }
  0xa1   : > { %v320_v13 = vpop.permute.xlu0 %319  ;;  %v303_v14 = vpop.permute.xlu1 %302 }
  0xa2   : > { %v325_v15 = vsel %vm323_vm1, %v318_v11, %v320_v13 }
  0xa3   : > { %385 = vmatprep.subr.mxu0 %v325_v15 }
  0xa4   : > { %386 = vmatpush1.msra.mxu0 %v324_v16 }
  0xa5   : > { %v305_v17 = vpop.permute.xlu0 %304  ;;  %v301_v18 = vpop.permute.xlu1 %300 }
  0xa6   : > { %v310_v19 = vsel %vm308_vm2, %v303_v14, %v305_v17  ;;  %v309_v20 = vsel %vm308_vm2, %v301_v18, %v303_v14 }
  0xa7   : > { %387 = vmatprep.subr.mxu0 %v310_v19 }
  0xa8   : > { %388 = vmatpush1.msra.mxu0 %v309_v20 }
  0xa9   : > { %v288_v21 = vpop.permute.xlu0 %287  ;;  %v290_v22 = vpop.permute.xlu1 %289 }
  0xaa   : > { %v295_v23 = vsel %vm293_vm3, %v288_v21, %v290_v22 }
  0xab   : > { %389 = vmatprep.subr.mxu0 %v295_v23 }
  0xad   : > { %v286_v24 = vpop.permute.xlu0 %285  ;;  %v273_v25 = vpop.permute.xlu1 %272 }
  0xae   : > { %v294_v26 = vsel %vm293_vm3, %v286_v24, %v288_v21 }
  0xaf   : > { %390 = vmatpush1.msra.mxu0 %v294_v26 }
  0xb1   : > { %v275_v27 = vpop.permute.xlu0 %274  ;;  %v271_v28 = vpop.permute.xlu1 %270 }
  0xb2   : > { %v280_v29 = vsel %vm278_vm4, %v273_v25, %v275_v27  ;;  %v279_v30 = vsel %vm278_vm4, %v271_v28, %v273_v25 }
  0xb3   : > { %391 = vmatprep.subr.mxu0 %v280_v29 }
  0xb4   : > { %392 = vmatpush1.msra.mxu0 %v279_v30 }
  0xb5   : > { %v258_v31 = vpop.permute.xlu0 %257  ;;  %v260_v32 = vpop.permute.xlu1 %259 }
  0xb6   : > { %v265_v33 = vsel %vm263_vm5, %v258_v31, %v260_v32 }
  0xb7   : > { %393 = vmatprep.subr.mxu0 %v265_v33 }
  0xb9   : > { %v322_v34 = vpop.permute.xlu0 %321  ;;  %v256_v35 = vpop.permute.xlu1 %255 }
  0xba   : > { %v264_v36 = vsel %vm263_vm5, %v256_v35, %v258_v31  ;;  %v326_v37 = vsel %vm323_vm1, %v320_v13, %v322_v34 }
  0xbb   : > { %394 = vmatpush1.msra.mxu0 %v264_v36  ;;  %691 = vmatprep.subr.mxu1 %v326_v37 }
  0xbc   : > { %692 = vmatpush3.msra.mxu1 %v326_v37 }
  0xbd   : > { %v243_v38 = vpop.permute.xlu0 %242  ;;  %v245_v39 = vpop.permute.xlu1 %244 }
  0xbe   : > { %v250_v40 = vsel %vm248_vm6, %v243_v38, %v245_v39 }
  0xbf   : > { %395 = vmatprep.subr.mxu0 %v250_v40 }
  0xc1   : > { %v307_v41 = vpop.permute.xlu0 %306  ;;  %v241_v42 = vpop.permute.xlu1 %240 }
  0xc2   : > { %v249_v43 = vsel %vm248_vm6, %v241_v42, %v243_v38  ;;  %v311_v44 = vsel %vm308_vm2, %v305_v17, %v307_v41 }
  0xc3   : > { %396 = vmatpush1.msra.mxu0 %v249_v43  ;;  %693 = vmatprep.subr.mxu1 %v311_v44 }
  0xc4   : > { %694 = vmatpush3.msra.mxu1 %v311_v44 }
  0xc5   : > { %v228_v45 = vpop.permute.xlu0 %227  ;;  %v230_v46 = vpop.permute.xlu1 %229 }
  0xc6   : > { %v235_v47 = vsel %vm233_vm7, %v228_v45, %v230_v46 }
  0xc7   : > { %397 = vmatprep.subr.mxu0 %v235_v47 }
  0xc9   : > { %v292_v48 = vpop.permute.xlu0 %291  ;;  %v226_v49 = vpop.permute.xlu1 %225 }
  0xca   : > { %v234_v50 = vsel %vm233_vm7, %v226_v49, %v228_v45  ;;  %v296_v51 = vsel %vm293_vm3, %v290_v22, %v292_v48 }
  0xcb   : > { %398 = vmatpush1.msra.mxu0 %v234_v50  ;;  %695 = vmatprep.subr.mxu1 %v296_v51 }
  0xcc   : > { %696 = vmatpush3.msra.mxu1 %v296_v51 }
  0xcd   : > { %v213_v52 = vpop.permute.xlu0 %212  ;;  %v215_v53 = vpop.permute.xlu1 %214 }
  0xce   : > { %v220_v54 = vsel %vm218_vm8, %v213_v52, %v215_v53 }
  0xcf   : > { %399 = vmatprep.subr.mxu0 %v220_v54 }
  0xd1   : > { %v277_v55 = vpop.permute.xlu0 %276  ;;  %v211_v56 = vpop.permute.xlu1 %210 }
  0xd2   : > { %v219_v57 = vsel %vm218_vm8, %v211_v56, %v213_v52  ;;  %v281_v58 = vsel %vm278_vm4, %v275_v27, %v277_v55 }
  0xd3   : > { %400 = vmatpush1.msra.mxu0 %v219_v57  ;;  %697 = vmatprep.subr.mxu1 %v281_v58 }
  0xd4   : > { %401 = vmatprep.subr.mxu0 %v1031_v0  ;;  %698 = vmatpush3.msra.mxu1 %v281_v58 }
  0xd5   : > { %v262_v59 = vpop.permute.xlu0 %261  ;;  %402 = vmatpush1.msra.mxu0 %v1033_v1  ;;  %v247_v60 = vpop.permute.xlu1 %246 }
  0xd6   : > { %666 = vmatmul.mubr.msk.f32.vlgmr.msra.gmra.mxu0 %vm358_vm0, %v1061_v5  ;;  %v266_v61 = vsel %vm263_vm5, %v260_v32, %v262_v59  ;;  %v251_v63 = vsel %vm248_vm6, %v245_v39, %v247_v60  ;;  %v332_v5 = vld [vmem:[%s1200_s1 + $0x10] sm:$0xff] }
  0xd7   : > { %699 = vmatprep.subr.mxu1 %v266_v61  ;;  %441 = vmatprep.mubr.f32.mxu0 %v911_v4 }
  0xd8   : > { %700 = vmatpush3.msra.mxu1 %v266_v61 }
  0xd9   : > { %v232_v0 = vpop.permute.xlu0 %231  ;;  %701 = vmatprep.subr.mxu1 %v251_v63  ;;  %v217_v3 = vpop.permute.xlu1 %216 }
  0xda   : > { %667 = vmatmul.mubr.msk.f32.gmra.mxu0 %vm358_vm0, %v331_v62  ;;  %702 = vmatpush3.msra.mxu1 %v251_v63  ;;  %v236_v1 = vsel %vm233_vm7, %v230_v46, %v232_v0  ;;  %v221_v6 = vsel %vm218_vm8, %v215_v53, %v217_v3 }
  0xdb   : > { %703 = vmatprep.subr.mxu1 %v236_v1  ;;  %447 = vmatprep.mubr.f32.mxu0 %v911_v4 }
  0xdc   : > { %704 = vmatpush3.msra.mxu1 %v236_v1 }
  0xdd   : > { %705 = vmatprep.subr.mxu1 %v221_v6 }
  0xde   : > { %668 = vmatmul.mubr.msk.f32.gmra.mxu0 %vm358_vm0, %v332_v5  ;;  %706 = vmatpush3.msra.mxu1 %v221_v6 }
  0xdf   : > { %707 = vmatprep.subr.mxu1 %v1037_v2  ;;  %453 = vmatprep.mubr.f32.mxu0 %v911_v4 }
  0xe0   : > { %708 = vmatpush3.msra.mxu1 %v1037_v2 }
  0xe1   : > { %710 = vmatmul.mubr.msk.f32.vlgmr.msra.gmra.mxu1 %vm358_vm0, %v331_v62 }
  0xe2   : > { %669 = vmatmul.mubr.msk.f32.gmra.mxu0 %vm358_vm0, %v333_v7  ;;  %712 = vmatprep.mubr.msk.f32.mxu1 %vm358_vm0, %v332_v5 }
  0xe5   : > { %713 = vmatmul.mubr.msk.f32.gmra.mxu1 %vm358_vm0, %v333_v7 }
  0xe6   : > { %v341_v8 = vpop.permute.xlu0 %340  ;;  %v346_v10 = vpop.permute.xlu1 %345 }
  0xea   : > { %v351_v15 = vpop.permute.xlu1 %350  ;;  %v356_v20 = vpop.permute.xlu0 %355 }
 0x196   : > { %v437_v9 = vpop.f32.mrf.mxu0 }
 0x197   : > { %v438_v11 = vadd.f32 %v437_v9, %v341_v8 }
 0x198   : > { %v439_v4 = vpop.f32.mrf.mxu0 }
 0x199   : > { %v440_v12 = vadd.f32 %v439_v4, %v341_v8  ;;  %545 = vst [vmem:[%s1130_s11] sm:$0xff] %v438_v11 }
 0x19a   : > { %v443_v2 = vpop.f32.mrf.mxu0 }
 0x19b   : > { %546 = vst [vmem:[%s1130_s11 + $0x8] sm:$0xff] %v440_v12  ;;  %v444_v13 = vadd.f32 %v443_v2, %v346_v10 }
 0x19c   : > { %v445_v14 = vpop.f32.mrf.mxu0 }
 0x19d   : > { %v446_v16 = vadd.f32 %v445_v14, %v346_v10  ;;  %548 = vst [vmem:[%s1130_s11 + $0x18] sm:$0xff] %v444_v13 }
 0x19e   : > { %v449_v17 = vpop.f32.mrf.mxu0 }
 0x19f   : > { %549 = vst [vmem:[%s1130_s11 + $0x20] sm:$0xff] %v446_v16  ;;  %v450_v18 = vadd.f32 %v449_v17, %v351_v15 }
 0x1a0   : > { %v451_v19 = vpop.f32.mrf.mxu0 }
 0x1a1   : > { %v711_v21 = vpop.f32.mrf.mxu1  ;;  %v452_v22 = vadd.f32 %v451_v19, %v351_v15  ;;  %551 = vst [vmem:[%s1130_s11 + $0x30] sm:$0xff] %v450_v18 }
 0x1a2   : > { %v532_v23 = vadd.f32 %v711_v21, %v346_v10  ;;  %v455_v24 = vpop.f32.mrf.mxu0 }
 0x1a3   : > { %552 = vst [vmem:[%s1130_s11 + $0x38] sm:$0xff] %v452_v22  ;;  %v456_v25 = vadd.f32 %v455_v24, %v356_v20  ;;  %v526_v26 = vpop.f32.mrf.mxu1 }
 0x1a4   : > { %550 = vst [vmem:[%s1130_s11 + $0x28] sm:$0xff] %v532_v23  ;;  %v527_v27 = vadd.f32 %v526_v26, %v341_v8  ;;  %v457_v28 = vpop.f32.mrf.mxu0 }
 0x1a5   : > { %554 = vst [vmem:[%s1130_s11 + $0x48] sm:$0xff] %v456_v25  ;;  %v458_v29 = vadd.f32 %v457_v28, %v356_v20  ;;  %v714_v30 = vpop.f32.mrf.mxu1 }
 0x1a6   : > { %547 = vst [vmem:[%s1130_s11 + $0x10] sm:$0xff] %v527_v27  ;;  %v542_v31 = vadd.f32 %v714_v30, %v356_v20 }
 0x1a7   : > { %555 = vst [vmem:[%s1130_s11 + $0x50] sm:$0xff] %v458_v29  ;;  %v536_v32 = vpop.f32.mrf.mxu1 }
 0x1a8   : > { %556 = vst [vmem:[%s1130_s11 + $0x58] sm:$0xff] %v542_v31  ;;  %v537_v33 = vadd.f32 %v536_v32, %v351_v15 }
 0x1aa   : > { %553 = vst [vmem:[%s1130_s11 + $0x40] sm:$0xff] %v537_v33 }
 0x1ab   : > { %834 = shalt.err (!%p831_p3)
}
 0x1ac   : > { %s835_s5 = scalar_lea.hbm %s1147_s28, 1536  ;;  %s839_s8 = scalar_lea.hbm %s1202_s3, 3072 }
 0x1ad   : > { %p836_p5 = scmp.ne.s32.totalorder %s1147_s28, %s835_s5  ;;  %p840_p10 = scmp.lt.s32.totalorder %s1147_s28, %s1202_s3 }
 0x1ae   : > { %p841_p4 = scmp.lt.s32.totalorder %s839_s8, %s835_s5 }
 0x1af   : > { %p837_p6 = pnand %p836_p5, %p988_p9 }
 0x1b0   : > { %p842_p13 = por %p841_p4, %p840_p10 }
 0x1b1   : > { %p838_p7 = pneg %p837_p6 }
 0x1b3   : > { %p843_p8 = pnand %p842_p13, %p838_p7 }
 0x1b5   : > { %846 = shalt.err (!%p843_p8)
}
 0x1b6   : > { %s915_s11 = smov 384   ;;  %s916_s18 = smov 24  }
 0x1b7   : > { %719 = dma.vmem_to_hbm [thread:$0]  (%p988_p9), %s1149_s19, 1536, %s1147_s28, %s558_s15, %s915_s11, %s915_s11, %s916_s18  }
 0x1b8 PF: > { %s588_s21 = sand.u32 1, %s881_s12   ;;  %p1208_p11 = scmp.ne.s32.totalorder %s1206_s27, 0 }
 0x1b9   : > { %p1209_p12 = scmp.ge.s32.totalorder %s901_s17, 2  ;;  %s589_s23 = scalar_lea.sflag [#allocation4], %s588_s21 }
 0x1bb   : > { %p726_p0 = pnand %p1209_p12, %p1208_p11 }
 0x1bd   : > { %p727_p1 = pneg %p726_p0 }
 0x1bf   : > { %876 = dma.done.wait (%p727_p1), %s589_s23, 1536  }
 0x1c0   : > { %878 = vsyncadd (%p727_p1), %s589_s23, 4294965760  ;;  %s19_s17 = sadd.s32 1, %s901_s17   ;;  %s1210_s12 = smov %s885_s13 }
 0x1c1   : > { %p16_p2 = scmp.ge.s32.totalorder %s19_s17, 4   ;;  %s1211_s13 = smov %s889_s14 }
 0x1c2   : > { %s1212_s14 = smov %s993_s26  ;;  %s1213_s15 = smov %s897_s16 }
 0x1c3   : > { %s1214_s16 = smov %s1216_s20  ;;  %18 = sbr.rel (!%p16_p2) target bundleno = 6 (0x6), region = 77 }
 0x1c8   :  { %594 = vsyncpa [#allocation3], 1 }
 0x1c9   :  { %596 = vsyncpa [#allocation3 + $0x1], 1 }
 0x1ca   :  { %597 = vsyncpa [#allocation4], 1 }
 0x1cb   :  { %599 = vsyncpa [#allocation4 + $0x1], 1 }

</bundles_post_ra>
